<compile_context>
chip_gen: v6e
topology: v6e:2x2x1
jax: 0.10.0
libtpu: 0.0.40
codegen_flags: <defaults>
</compile_context>

<pallas_src>
import functools

import jax
import jax.numpy as jnp
from jax import lax
from jax.experimental import pallas as pl
from jax.experimental.pallas import tpu as pltpu


def _round_up(x, m):
    return ((x + m - 1) // m) * m


def _pick_tile(n, cap, unit):
    """Pick a tile size (multiple of `unit`, <= cap) that keeps padding small.

    Returns (tile, padded_n).  Prefers the largest tile whose padding waste is
    <= max(unit, n/8); always succeeds because tile == unit gives zero waste.
    """
    np_ = _round_up(n, unit)
    cap = max(unit, (min(cap, np_) // unit) * unit)
    budget = max(unit, np_ // 8)
    tile = unit
    for t in range(cap, 0, -unit):
        if _round_up(np_, t) - np_ <= budget:
            tile = t
            break
    return tile, _round_up(np_, tile)


def liner_kernel(x_ref, w_ref, b_ref, o_ref, acc_ref, sq_ref, *, cache_sq):
    # x_ref: (TB, TK)   raw (un-normalized) activation tile, MXU dtype
    # w_ref: (TK, TC)   weight tile, already transposed to (D, C) layout
    # b_ref: (1, TC)    bias tile (f32)
    # o_ref: (TB, TC)   output tile
    # acc_ref: (TB, TC) f32 accumulator scratch
    # sq_ref:  (TB, 1)  f32 row squared-norm scratch
    k = pl.program_id(2)
    nk = pl.num_programs(2)

    @pl.when(k == 0)
    def _():
        acc_ref[...] = jnp.zeros_like(acc_ref)

    x = x_ref[...]

    if cache_sq:
        # Row sq-norm computed only while the first column tile (j == 0) is
        # being processed; the x blocks are identical for every j, so the
        # cached value stays valid for j > 0.  (j axis is "arbitrary" so a
        # megacore split cannot skip j == 0.)
        j = pl.program_id(1)

        @pl.when(jnp.logical_and(j == 0, k == 0))
        def _():
            sq_ref[...] = jnp.zeros_like(sq_ref)

        @pl.when(j == 0)
        def _():
            xf = x.astype(jnp.float32)
            sq_ref[...] += jnp.sum(xf * xf, axis=1, keepdims=True)
    else:
        # Recompute per (row-tile, col-tile): megacore-safe under any grid
        # sharding; cost is ~1/TC of the MXU MACs and rides the VPU/XLU.
        @pl.when(k == 0)
        def _():
            sq_ref[...] = jnp.zeros_like(sq_ref)

        xf = x.astype(jnp.float32)
        sq_ref[...] += jnp.sum(xf * xf, axis=1, keepdims=True)

    # Plain (TB,TK) x (TK,TC) MXU matmul on the raw activations, f32 accumulate.
    acc_ref[...] += jnp.dot(x, w_ref[...], preferred_element_type=jnp.float32)

    @pl.when(k == nk - 1)
    def _():
        # (x * inv) @ W == inv * (x @ W): apply the L2-norm scale to the small
        # (TB,TC) f32 accumulator instead of the (TB,Dp) operand.
        inv = lax.rsqrt(jnp.maximum(sq_ref[...], 1e-24))  # == 1/max(||x||,1e-12)
        out = acc_ref[...] * inv + b_ref[...].astype(jnp.float32)
        o_ref[...] = out.astype(o_ref.dtype)


def liner_forward(xt, weight, bias, *, tb_max=256, tc_max=512, tk_max=1536):
    """xt: (B, D), weight: (num_class, D) [PyTorch layout], bias: (num_class,)."""
    B, D = xt.shape
    C = weight.shape[0]

    # bf16 inputs -> bf16 MXU operands (full rate, half the HBM weight bytes);
    # f32 inputs stay f32 for exactness.  Accumulation is f32 either way.
    mxu_dtype = jnp.bfloat16 if xt.dtype == jnp.bfloat16 else jnp.float32
    op_bytes = 2 if mxu_dtype == jnp.bfloat16 else 4

    TB, Bp = _pick_tile(B, tb_max, 8)
    TC, Cp = _pick_tile(C, tc_max, 128)
    TK, Dp = _pick_tile(D, tk_max, 128)
    gi, gj, gk = Bp // TB, Cp // TC, Dp // TK

    # Megacore (v7x): avoid a 1x1 (row, col) grid so both TensorCores get work.
    if gi == 1 and gj == 1:
        if Cp >= 256 and (Cp // 128) % 2 == 0:
            TC, gj = Cp // 2, 2
        elif Bp >= 16 and (Bp // 8) % 2 == 0:
            TB, gi = Bp // 2, 2

    # When K fits one block, hold the larger operand resident (outer axis) and
    # re-stream the smaller one; otherwise the order does not change HBM bytes.
    swap_ij = (gk == 1) and ((gj - 1) * Bp < (gi - 1) * Cp)
    # Cache the row sq-norm across column tiles only when it is both correct
    # under megacore (j marked "arbitrary") and worth giving up the j split.
    cache_sq = (not swap_ij) and gi >= 2 and gj >= 2

    # Lane-dense zero padding (changes neither the norm nor the dot product).
    x_p = xt.astype(mxu_dtype)
    if (Bp, Dp) != (B, D):
        x_p = jnp.pad(x_p, ((0, Bp - B), (0, Dp - D)))
    w_p = weight.astype(mxu_dtype)
    if (Cp, Dp) != (C, D):
        w_p = jnp.pad(w_p, ((0, Cp - C), (0, Dp - D)))
    # One-time transpose to (Dp, Cp) so the kernel does a plain matmul with no
    # vxpose.  TODO(synk): in a real deployment do this at parameter-conversion
    # time, not per forward call.
    w_p = w_p.T
    b_p = bias.astype(jnp.float32)
    if Cp != C:
        b_p = jnp.pad(b_p, (0, Cp - C))
    b_p = b_p.reshape(1, Cp)

    if swap_ij:  # axis0 = column tiles (resident weight), axis1 = row tiles
        grid = (gj, gi, gk)
        x_spec = pl.BlockSpec((TB, TK), lambda a, b, k: (b, k))
        w_spec = pl.BlockSpec((TK, TC), lambda a, b, k: (k, a))
        b_spec = pl.BlockSpec((1, TC), lambda a, b, k: (0, a))
        o_spec = pl.BlockSpec((TB, TC), lambda a, b, k: (b, a))
    else:        # axis0 = row tiles (resident activations), axis1 = column tiles
        grid = (gi, gj, gk)
        x_spec = pl.BlockSpec((TB, TK), lambda i, j, k: (i, k))
        w_spec = pl.BlockSpec((TK, TC), lambda i, j, k: (k, j))
        b_spec = pl.BlockSpec((1, TC), lambda i, j, k: (0, j))
        o_spec = pl.BlockSpec((TB, TC), lambda i, j, k: (i, j))

    semantics = (("parallel", "arbitrary", "arbitrary") if cache_sq
                 else ("parallel", "parallel", "arbitrary"))

    # Advisory cost: real element sizes and re-streamed operand bytes.
    x_bytes = Bp * Dp * op_bytes
    w_bytes = Dp * Cp * op_bytes
    o_bytes = Bp * Cp * xt.dtype.itemsize
    if gk == 1:
        x_reads = x_bytes * (gj if swap_ij else 1)
        w_reads = w_bytes * (1 if swap_ij else gi)
    else:
        x_reads = x_bytes * gj
        w_reads = w_bytes * gi
    cost = pl.CostEstimate(
        flops=2 * Bp * Cp * Dp,
        transcendentals=Bp * gj,          # one rsqrt per row per column tile
        bytes_accessed=x_reads + w_reads + o_bytes + Cp * 4,
    )

    out_p = pl.pallas_call(
        functools.partial(liner_kernel, cache_sq=cache_sq),
        out_shape=jax.ShapeDtypeStruct((Bp, Cp), xt.dtype),
        grid=grid,
        in_specs=[x_spec, w_spec, b_spec],
        out_specs=o_spec,
        scratch_shapes=[
            pltpu.VMEM((TB, TC), jnp.float32),   # matmul accumulator
            pltpu.VMEM((TB, 1), jnp.float32),    # row squared-norm
        ],
        compiler_params=pltpu.CompilerParams(
            dimension_semantics=semantics,
            vmem_limit_bytes=32 * 1024 * 1024),
        cost_estimate=cost,
    )(x_p, w_p, b_p)

    return out_p[:B, :C]


if __name__ == "__main__":
    # Small shapes consistent with the module: dim=64, gost=3 -> D=192,
    # num_class=120, batch B=8.
    B = 8
    dim, gost = 64, 3
    D = dim * gost
    num_class = 120

    key = jax.random.PRNGKey(0)
    k_x, k_w = jax.random.split(key)

    xt = jax.random.normal(k_x, (B, D), dtype=jnp.float32)
    # Deterministic parameter init matching __init__:
    #   fc.weight ~ N(0, 0.01), fc.bias = 0
    weight = 0.01 * jax.random.normal(k_w, (num_class, D), dtype=jnp.float32)
    bias = jnp.zeros((num_class,), dtype=jnp.float32)

    def ref_forward(x, w, b):
        x32 = x.astype(jnp.float32)
        nrm = jnp.maximum(jnp.sqrt(jnp.sum(x32 * x32, axis=1, keepdims=True)),
                          1e-12)
        return (x32 / nrm) @ w.astype(jnp.float32).T + b.astype(jnp.float32)

    # f32 path.
    out = jax.block_until_ready(liner_forward(xt, weight, bias))
    ref = ref_forward(xt, weight, bias)
    assert out.shape == (B, num_class)
    assert jnp.allclose(out, ref, atol=1e-5, rtol=1e-4)

    # bf16 path (weight streams as bf16, f32 accumulation).
    xt_bf = xt.astype(jnp.bfloat16)
    w_bf = weight.astype(jnp.bfloat16)
    out_bf = jax.block_until_ready(liner_forward(xt_bf, w_bf, bias))
    ref_bf = ref_forward(xt_bf, w_bf, bias)
    assert out_bf.shape == (B, num_class)
    assert jnp.allclose(out_bf.astype(jnp.float32), ref_bf, atol=2e-2, rtol=2e-2)

    print("KERNEL_OK")
</pallas_src>

<mosaic_0001>
module attributes {stable_mosaic.version = 11 : i64} {
  func.func @liner_kernel(%arg0: i32, %arg1: i32, %arg2: i32, %arg3: memref<8x256xf32, #tpu.memory_space<vmem>>, %arg4: memref<256x128xf32, #tpu.memory_space<vmem>>, %arg5: memref<1x128xf32, #tpu.memory_space<vmem>>, %arg6: memref<8x128xf32, #tpu.memory_space<vmem>>, %arg7: memref<8x128xf32, #tpu.memory_space<vmem>>, %arg8: memref<8x1xf32, #tpu.memory_space<vmem>>) attributes {dimension_semantics = [#tpu.dimension_semantics<parallel>, #tpu.dimension_semantics<parallel>, #tpu.dimension_semantics<arbitrary>], iteration_bounds = array<i64: 1, 1, 1>, scalar_prefetch = 0 : i64, scratch_operands = 2 : i64, tpu.core_type = #tpu.core_type<tc>, window_params = [{transform_indices = @transform_0, window_bounds = array<i64: 8, 256>}, {transform_indices = @transform_1, window_bounds = array<i64: 256, 128>}, {transform_indices = @transform_2, window_bounds = array<i64: 1, 128>}, {transform_indices = @transform_3, window_bounds = array<i64: 8, 128>}]} {
    %c0_i32 = arith.constant 0 : i32
    %0 = arith.cmpi eq, %arg2, %c0_i32 : i32
    %1 = arith.extui %0 : i1 to i32
    %c0_i32_0 = arith.constant 0 : i32
    %2 = arith.cmpi ne, %1, %c0_i32_0 : i32
    scf.if %2 {
      %cst_17 = arith.constant 0.000000e+00 : f32
      %21 = vector.broadcast %cst_17 : f32 to vector<8x128xf32>
      %c0_18 = arith.constant 0 : index
      %c0_19 = arith.constant 0 : index
      %22 = vector.load %arg7[%c0_18, %c0_19] : memref<8x128xf32, #tpu.memory_space<vmem>>, vector<8x128xf32>
      tpu.vector_store %arg7[%c0_18, %c0_19], %21 {strides = array<i32>} : memref<8x128xf32, #tpu.memory_space<vmem>>, vector<8x128xf32>,
    } else {
    }
    %c0 = arith.constant 0 : index
    %c0_1 = arith.constant 0 : index
    %3 = vector.load %arg3[%c0, %c0_1] : memref<8x256xf32, #tpu.memory_space<vmem>>, vector<8x256xf32>
    %c0_i32_2 = arith.constant 0 : i32
    %4 = arith.cmpi eq, %arg2, %c0_i32_2 : i32
    %5 = arith.extui %4 : i1 to i32
    %c0_i32_3 = arith.constant 0 : i32
    %6 = arith.cmpi ne, %5, %c0_i32_3 : i32
    scf.if %6 {
      %cst_17 = arith.constant 0.000000e+00 : f32
      %21 = vector.broadcast %cst_17 : f32 to vector<8x1xf32>
      %c0_18 = arith.constant 0 : index
      %c0_19 = arith.constant 0 : index
      %22 = vector.load %arg8[%c0_18, %c0_19] : memref<8x1xf32, #tpu.memory_space<vmem>>, vector<8x1xf32>
      tpu.vector_store %arg8[%c0_18, %c0_19], %21 {strides = array<i32>} : memref<8x1xf32, #tpu.memory_space<vmem>>, vector<8x1xf32>,
    } else {
    }
    %c0_4 = arith.constant 0 : index
    %c0_5 = arith.constant 0 : index
    %7 = vector.load %arg8[%c0_4, %c0_5] : memref<8x1xf32, #tpu.memory_space<vmem>>, vector<8x1xf32>
    %8 = arith.mulf %3, %3 : vector<8x256xf32>
    %cst = arith.constant dense<0.000000e+00> : vector<8xf32>
    %9 = vector.multi_reduction <add>, %8, %cst [1] : vector<8x256xf32> to vector<8xf32>
    %10 = vector.shape_cast %9 : vector<8xf32> to vector<8x1xf32>
    %11 = arith.addf %7, %10 : vector<8x1xf32>
    %c0_6 = arith.constant 0 : index
    %c0_7 = arith.constant 0 : index
    %12 = vector.load %arg8[%c0_6, %c0_7] : memref<8x1xf32, #tpu.memory_space<vmem>>, vector<8x1xf32>
    tpu.vector_store %arg8[%c0_6, %c0_7], %11 {strides = array<i32>} : memref<8x1xf32, #tpu.memory_space<vmem>>, vector<8x1xf32>,
    %c0_8 = arith.constant 0 : index
    %c0_9 = arith.constant 0 : index
    %13 = vector.load %arg7[%c0_8, %c0_9] : memref<8x128xf32, #tpu.memory_space<vmem>>, vector<8x128xf32>
    %c0_10 = arith.constant 0 : index
    %c0_11 = arith.constant 0 : index
    %14 = vector.load %arg4[%c0_10, %c0_11] : memref<256x128xf32, #tpu.memory_space<vmem>>, vector<256x128xf32>
    %cst_12 = arith.constant dense<0.000000e+00> : vector<8x128xf32>
    %15 = tpu.matmul %3, %14, %cst_12 {dimension_numbers = #tpu.dot_dimension_numbers<[1], [0], [0], [1], [0, 0, 1, 1], [], []>} : vector<8x256xf32>, vector<256x128xf32>, vector<8x128xf32> -> vector<8x128xf32>
    %16 = arith.addf %13, %15 : vector<8x128xf32>
    %c0_13 = arith.constant 0 : index
    %c0_14 = arith.constant 0 : index
    %17 = vector.load %arg7[%c0_13, %c0_14] : memref<8x128xf32, #tpu.memory_space<vmem>>, vector<8x128xf32>
    tpu.vector_store %arg7[%c0_13, %c0_14], %16 {strides = array<i32>} : memref<8x128xf32, #tpu.memory_space<vmem>>, vector<8x128xf32>,
    %c0_i32_15 = arith.constant 0 : i32
    %18 = arith.cmpi eq, %arg2, %c0_i32_15 : i32
    %19 = arith.extui %18 : i1 to i32
    %c0_i32_16 = arith.constant 0 : i32
    %20 = arith.cmpi ne, %19, %c0_i32_16 : i32
    scf.if %20 {
      %c0_17 = arith.constant 0 : index
      %c0_18 = arith.constant 0 : index
      %21 = vector.load %arg8[%c0_17, %c0_18] : memref<8x1xf32, #tpu.memory_space<vmem>>, vector<8x1xf32>
      %cst_19 = arith.constant 1.000000e-24 : f32
      %22 = vector.broadcast %cst_19 : f32 to vector<8x1xf32>
      %23 = arith.maximumf %21, %22 : vector<8x1xf32>
      %24 = math.rsqrt %23 : vector<8x1xf32>
      %c0_20 = arith.constant 0 : index
      %c0_21 = arith.constant 0 : index
      %25 = vector.load %arg7[%c0_20, %c0_21] : memref<8x128xf32, #tpu.memory_space<vmem>>, vector<8x128xf32>
      %26 = vector.broadcast %24 : vector<8x1xf32> to vector<8x128xf32>
      %27 = arith.mulf %25, %26 : vector<8x128xf32>
      %c0_22 = arith.constant 0 : index
      %c0_23 = arith.constant 0 : index
      %28 = vector.load %arg5[%c0_22, %c0_23] : memref<1x128xf32, #tpu.memory_space<vmem>>, vector<1x128xf32>
      %29 = vector.broadcast %28 : vector<1x128xf32> to vector<8x128xf32>
      %30 = arith.addf %27, %29 : vector<8x128xf32>
      %c0_24 = arith.constant 0 : index
      %c0_25 = arith.constant 0 : index
      %31 = vector.load %arg6[%c0_24, %c0_25] : memref<8x128xf32, #tpu.memory_space<vmem>>, vector<8x128xf32>
      tpu.vector_store %arg6[%c0_24, %c0_25], %30 {strides = array<i32>} : memref<8x128xf32, #tpu.memory_space<vmem>>, vector<8x128xf32>,
    } else {
    }
    return
  }
  func.func @transform_0(%arg0: i32, %arg1: i32, %arg2: i32) -> (i32, i32) {
    %c0_i32 = arith.constant 0 : i32
    return %arg0, %arg2 : i32, i32
  }
  func.func @transform_1(%arg0: i32, %arg1: i32, %arg2: i32) -> (i32, i32) {
    %c0_i32 = arith.constant 0 : i32
    return %arg2, %arg1 : i32, i32
  }
  func.func @transform_2(%arg0: i32, %arg1: i32, %arg2: i32) -> (i32, i32) {
    %c0_i32 = arith.constant 0 : i32
    %c0_i32_0 = arith.constant 0 : i32
    return %c0_i32, %arg1 : i32, i32
  }
  func.func @transform_3(%arg0: i32, %arg1: i32, %arg2: i32) -> (i32, i32) {
    %c0_i32 = arith.constant 0 : i32
    return %arg0, %arg1 : i32, i32
  }
}

</mosaic_0001>

<bundles_post_ra>
// kernel: tpu_custom_call.1
= control target key start
LH: loop header
LB: loop body
LE: loop exit
PB: predicated region body
PF: predicated region fallthrough
CT: control target
= control target key end

     0   :  { %8 = vsyncpa [#allocation5], 0  ;;  %s363_s0 = inlined_call_operand.hbm [shape: f32[8,256], index: 0, kind: input, shape index: {}]   ;;  %s364_s1 = inlined_call_operand.hbm [shape: f32[256,128], index: 1, kind: input, shape index: {}]   ;;  %s365_s2 = inlined_call_operand.vmem [shape: f32[1,128], index: 2, kind: input, shape index: {}]   ;;  %s366_s3 = inlined_call_operand.hbm [shape: f32[8,128], index: 3, kind: output, shape index: {}]  }
   0x1   :  { %9 = vsyncpa [#allocation8], 0 }
   0x2   :  { %10 = vsyncpa [#allocation6], 0  ;;  %s317_s12 = smov [#allocation4]   ;;  %s318_s14 = smov [#allocation7]  }
   0x3   :  { %s17_s13 = sshll.u32 %s317_s12, 4  ;;  %s26_s15 = sshll.u32 %s318_s14, 4  ;;  %s18_s13 = int_to_ptr.vmem [resolvable:$true] %s17_s13  ;;  %s27_s15 = int_to_ptr.vmem [resolvable:$true] %s26_s15 }
   0x4   :  { %s259_s16 = scalar_lea.vmem %s18_s13, 256  ;;  %p264_p1 = scmp.lt.s32.totalorder %s18_s13, %s18_s13 }
   0x5   :  { %p260_p0 = scmp.ne.s32.totalorder %s18_s13, %s259_s16  ;;  %p265_p2 = scmp.lt.s32.totalorder %s259_s16, %s259_s16 }
   0x7   :  { %p266_p3 = por %p265_p2, %p264_p1 }
   0x9   :  { %p267_p4 = pnand %p266_p3, %p260_p0 }
   0xb   :  { %270 = shalt.err (!%p267_p4)
}
   0xc   :  { %20 = dma.hbm_to_vmem [thread:$0]  %s363_s0, 256, %s18_s13, [#allocation5]  }
   0xd   :  { %s279_s19 = scalar_lea.vmem %s27_s15, 4096  ;;  %p284_p6 = scmp.lt.s32.totalorder %s27_s15, %s27_s15 }
   0xe   :  { %p280_p5 = scmp.ne.s32.totalorder %s27_s15, %s279_s19  ;;  %p285_p7 = scmp.lt.s32.totalorder %s279_s19, %s279_s19 }
  0x10   :  { %p286_p8 = por %p285_p7, %p284_p6 }
  0x12   :  { %p287_p9 = pnand %p286_p8, %p280_p5 }
  0x14   :  { %290 = shalt.err (!%p287_p9)
}
  0x15   :  { %s319_s20 = smov 128   ;;  %s320_s21 = smov 8  }
  0x16   :  { %32 = dma.hbm_to_vmem [thread:$0]  %s364_s1, 4096, %s27_s15, [#allocation8], %s319_s20, %s319_s20, %s320_s21  }
  0x17   :  { %311 = dma.done.wait [#allocation5], 256  }
  0x18   :  { %312 = vsyncadd [#allocation5], 4294967040 }
  0x19   :  { %313 = dma.done.wait [#allocation8], 4096  }
  0x1a   :  { %314 = vsyncadd [#allocation8], 4294963200  ;;  %vm51_vm0 = vcmask 7168   ;;  %v321_v0 = vmov 0.0   ;;  %v351_v1 = vld [vmem:[#allocation4] sm:$0xff]  ;;  %v47_v2 = vld [vmem:[#allocation4 + $0x8] sm:$0xff] }
  0x1b   :  { %52 = vst.msk [vmem:[#allocation3] sm:$0xff] %vm51_vm0, %v321_v0  ;;  %v94_v3 = vld [vmem:[#allocation7 + $0xf8] sm:$0xff]  ;;  %v54_v4 = vmul.f32 %v351_v1, %v351_v1  ;;  %v55_v5 = vmul.f32 %v47_v2, %v47_v2  ;;  %v93_v7 = vld [vmem:[#allocation7 + $0xf0] sm:$0xff]  ;;  %159 = vmatprep.mubr.f32.mxu0 %v47_v2  ;;  %v92_v9 = vld [vmem:[#allocation7 + $0xe8] sm:$0xff]  ;;  %v322_v27 = vmov 0   ;;  %s323_s24 = smov [#allocation9]  }
  0x1c   :  { %206 = vmatprep.subr.mxu0 %v94_v3  ;;  %v78_v6 = vld [vmem:[#allocation7 + $0x78] sm:$0xff]  ;;  %v77_v8 = vld [vmem:[#allocation7 + $0x70] sm:$0xff]  ;;  %v76_v11 = vld [vmem:[#allocation7 + $0x68] sm:$0xff]  ;;  %248 = vset.pattern.permute.xlu0 %v322_v27  ;;  %s195_s25 = sshll.u32 %s323_s24, 4  ;;  %s196_s25 = int_to_ptr.vmem [resolvable:$true] %s195_s25 }
  0x1d   :  { %207 = vmatpush3.msra.mxu0 %v78_v6  ;;  %v56_v10 = vadd.f32 %v55_v5, %v54_v4  ;;  %v91_v12 = vld [vmem:[#allocation7 + $0xe0] sm:$0xff]  ;;  %v90_v14 = vld [vmem:[#allocation7 + $0xd8] sm:$0xff]  ;;  %v89_v16 = vld [vmem:[#allocation7 + $0xd0] sm:$0xff]  ;;  %s291_s26 = scalar_lea.vmem %s196_s25, 128  ;;  %p296_p11 = scmp.lt.s32.totalorder %s196_s25, %s196_s25 }
  0x1e   :  { %208 = vmatprep.subr.mxu0 %v93_v7  ;;  %v75_v13 = vld [vmem:[#allocation7 + $0x60] sm:$0xff]  ;;  %v74_v15 = vld [vmem:[#allocation7 + $0x58] sm:$0xff]  ;;  %v73_v17 = vld [vmem:[#allocation7 + $0x50] sm:$0xff]  ;;  %p292_p10 = scmp.ne.s32.totalorder %s196_s25, %s291_s26  ;;  %p297_p12 = scmp.lt.s32.totalorder %s291_s26, %s291_s26 }
  0x1f   :  { %209 = vmatpush3.msra.mxu0 %v77_v8  ;;  %57 = vadd.xlane.f32.xlu0 %v56_v10  ;;  %v88_v18 = vld [vmem:[#allocation7 + $0xc8] sm:$0xff]  ;;  %v87_v20 = vld [vmem:[#allocation7 + $0xc0] sm:$0xff]  ;;  %v86_v22 = vld [vmem:[#allocation7 + $0xb8] sm:$0xff] }
  0x20   :  { %210 = vmatprep.subr.mxu0 %v92_v9  ;;  %v72_v19 = vld [vmem:[#allocation7 + $0x48] sm:$0xff]  ;;  %v71_v21 = vld [vmem:[#allocation7 + $0x40] sm:$0xff]  ;;  %v70_v23 = vld [vmem:[#allocation7 + $0x38] sm:$0xff]  ;;  %p298_p13 = por %p297_p12, %p296_p11 }
  0x21   :  { %211 = vmatpush3.msra.mxu0 %v76_v11  ;;  %v85_v24 = vld [vmem:[#allocation7 + $0xb0] sm:$0xff]  ;;  %v84_v26 = vld [vmem:[#allocation7 + $0xa8] sm:$0xff]  ;;  %v83_v29 = vld [vmem:[#allocation7 + $0xa0] sm:$0xff] }
  0x22   :  { %212 = vmatprep.subr.mxu0 %v91_v12  ;;  %v69_v25 = vld [vmem:[#allocation7 + $0x30] sm:$0xff]  ;;  %v68_v28 = vld [vmem:[#allocation7 + $0x28] sm:$0xff]  ;;  %v67_v30 = vld [vmem:[#allocation7 + $0x20] sm:$0xff]  ;;  %p299_p0 = pnand %p298_p13, %p292_p10 }
  0x23   :  { %213 = vmatpush3.msra.mxu0 %v75_v13  ;;  %v82_v31 = vld [vmem:[#allocation7 + $0x98] sm:$0xff]  ;;  %v81_v33 = vld [vmem:[#allocation7 + $0x90] sm:$0xff]  ;;  %v80_v35 = vld [vmem:[#allocation7 + $0x88] sm:$0xff] }
  0x24   :  { %214 = vmatprep.subr.mxu0 %v90_v14  ;;  %v66_v32 = vld [vmem:[#allocation7 + $0x18] sm:$0xff]  ;;  %v65_v34 = vld [vmem:[#allocation7 + $0x10] sm:$0xff]  ;;  %v64_v36 = vld [vmem:[#allocation7 + $0x8] sm:$0xff] }
  0x25   :  { %215 = vmatpush3.msra.mxu0 %v74_v15  ;;  %v79_v37 = vld [vmem:[#allocation7 + $0x80] sm:$0xff]  ;;  %v53_v39 = vld [vmem:[#allocation3] sm:$0xff] }
  0x26   :  { %216 = vmatprep.subr.mxu0 %v89_v16  ;;  %v63_v38 = vld [vmem:[#allocation7] sm:$0xff]  ;;  %v205_v48 = vld [vmem:[%s365_s2] ss:$0 sm:$0xff] }
  0x27   :  { %217 = vmatpush3.msra.mxu0 %v73_v17 }
  0x28   :  { %218 = vmatprep.subr.mxu0 %v88_v18 }
  0x29   :  { %219 = vmatpush3.msra.mxu0 %v72_v19 }
  0x2a   :  { %220 = vmatprep.subr.mxu0 %v87_v20 }
  0x2b   :  { %221 = vmatpush3.msra.mxu0 %v71_v21 }
  0x2c   :  { %222 = vmatprep.subr.mxu0 %v86_v22 }
  0x2d   :  { %223 = vmatpush3.msra.mxu0 %v70_v23 }
  0x2e   :  { %224 = vmatprep.subr.mxu0 %v85_v24 }
  0x2f   :  { %225 = vmatpush3.msra.mxu0 %v69_v25 }
  0x30   :  { %226 = vmatprep.subr.mxu0 %v84_v26 }
  0x31   :  { %227 = vmatpush3.msra.mxu0 %v68_v28 }
  0x32   :  { %228 = vmatprep.subr.mxu0 %v83_v29 }
  0x33   :  { %229 = vmatpush3.msra.mxu0 %v67_v30 }
  0x34   :  { %230 = vmatprep.subr.mxu0 %v82_v31 }
  0x35   :  { %231 = vmatpush3.msra.mxu0 %v66_v32 }
  0x36   :  { %232 = vmatprep.subr.mxu0 %v81_v33 }
  0x37   :  { %233 = vmatpush3.msra.mxu0 %v65_v34 }
  0x38   :  { %234 = vmatprep.subr.mxu0 %v80_v35 }
  0x39   :  { %235 = vmatpush3.msra.mxu0 %v64_v36 }
  0x3a   :  { %236 = vmatprep.subr.mxu0 %v79_v37 }
  0x3b   :  { %237 = vmatpush3.msra.mxu0 %v63_v38 }
  0x3c   :  { %160 = vmatmul.mubr.f32.vlgmr.msra.gmra.mxu0 %v351_v1 }
  0xa8   :  { %v58_v40 = vpop.xlane.xlu0 %57 }
  0xa9   :  { %v59_v41 = vadd.f32 %v58_v40, %v53_v39 }
  0xab   :  { %61 = vst.msk [vmem:[#allocation3] sm:$0xff] %vm51_vm0, %v59_v41 }
  0xb2   :  { %v170_v42 = vld [vmem:[#allocation3] sm:$0xff] }
  0xb3   :  { %v171_v43 = vmax.f32 %v170_v42, 1e-24 }
  0xb5   :  { %249 = vrsqrt.f32 %v171_v43 }
  0xc2   :  { %v250_v44 = vpop.eup %249 }
  0xc3   :  { %176 = vperm.xlu0 %248, %v250_v44  }
  0xfc   :  { %v238_v45 = vpop.f32.mrf.mxu0 }
  0xfe   :  { %v239_v46 = vpop.f32.mrf.mxu0 }
  0xff   :  { %v240_v47 = vadd.f32 %v239_v46, %v238_v45 }
 0x13e   :  { %v177_v49 = vpop.permute.xlu0 %176 }
 0x13f   :  { %v179_v50 = vmul.f32 %v240_v47, %v177_v49 }
 0x141   :  { %v187_v51 = vadd.f32 %v205_v48, %v179_v50 }
 0x143   :  { %188 = vst [vmem:[#allocation9] sm:$0xff] %v187_v51 }
 0x144   :  { %302 = shalt.err (!%p299_p0)
}
 0x145   :  { %198 = dma.vmem_to_hbm [thread:$0]  %s196_s25, 128, %s366_s3, [#allocation6]  }
 0x146   :  { %315 = dma.done.wait [#allocation6], 128  }
 0x147   :  { %316 = vsyncadd [#allocation6], 4294967168 }
 0x148   :  { %202 = vsyncpa [#allocation5], 1 }
 0x149   :  { %203 = vsyncpa [#allocation8], 1 }
 0x14a   :  { %204 = vsyncpa [#allocation6], 1 }

</bundles_post_ra>
